<compile_context>
chip_gen: v7x
topology: tpu7x:2x2x1
jax: 0.10.0
libtpu: 0.0.40
codegen_flags: <defaults>
</compile_context>

<pallas_src>
import functools

import jax
import jax.numpy as jnp
from jax import lax
from jax.experimental import pallas as pl
from jax.experimental.pallas import tpu as pltpu


def _make_sdpa_kernel(scale, has_mask, emit_attn):
    def kernel(*refs):
        idx = 0
        q_ref = refs[idx]; idx += 1
        k_ref = refs[idx]; idx += 1
        v_ref = refs[idx]; idx += 1
        mask_ref = None
        if has_mask:
            mask_ref = refs[idx]; idx += 1
        ctx_ref = refs[idx]; idx += 1
        attn_ref = refs[idx] if emit_attn else None

        q = q_ref[0]                      # (bq, D)   native dtype
        k = k_ref[0]                      # (Lk, D)   native dtype
        v = v_ref[0]                      # (Lk, Dv)  native dtype

        if scale != 1.0:
            # Fold the scalar into the (bq, D) operand instead of the (bq, Lk) scores:
            # factor Lk/D fewer VPU multiplies per step; the softmax result is unchanged
            # (identical scores up to one rounding per q element).
            q = q * scale

        # scores = q @ k^T on the MXU, contracting the last dim of both operands
        # (no transposed copy of k), accumulated in f32.
        scores = lax.dot_general(
            q, k, dimension_numbers=(((1,), (1,)), ((), ())),
            preferred_element_type=jnp.float32)            # (bq, Lk) f32

        if has_mask:
            keep = 1.0 - mask_ref[0].astype(jnp.float32)   # (bq, Lk) f32
            scores = scores * keep

        # softmax over the last axis (dim=2 of the full array), f32 math on the VPU/EUP.
        mx = jnp.max(scores, axis=-1, keepdims=True)
        e = jnp.exp(scores - mx)
        denom = jnp.sum(e, axis=-1, keepdims=True)
        # denom is only (bq, 1): the exact reciprocal is negligible cost and keeps the
        # returned attention numerically tight to the reference.
        attn = e * pl.reciprocal(denom, approx=False)

        if has_mask:
            attn = attn * keep            # post-softmax mask (clamp() is a discarded no-op)

        # context = attn @ v on the MXU; probabilities in v's dtype (bf16 fast path when
        # operands are bf16), f32 accumulation.
        ctx = lax.dot_general(
            attn.astype(v.dtype), v,
            dimension_numbers=(((1,), (0,)), ((), ())),
            preferred_element_type=jnp.float32)            # (bq, Dv) f32

        ctx_ref[0] = ctx.astype(ctx_ref.dtype)
        if emit_attn:
            attn_ref[0] = attn.astype(attn_ref.dtype)

    return kernel


def _vmem_capacity_bytes():
    """Physical per-core VMEM; conservative 64 MiB (v7x) fallback if the query fails."""
    try:
        info = pltpu.get_tpu_info()
        cap = getattr(info, "vmem_capacity_bytes", None)
        if cap:
            return int(cap)
    except Exception:
        pass
    return 64 * 1024 * 1024


def _estimate_step_vmem(bq, Lk, D, Dv, qkv_isz, mask_isz, attn_isz, ctx_isz,
                        has_mask, emit_attn):
    """Approximate per-step VMEM footprint of the auto-pipelined kernel
    (double-buffered blocks + live f32 temporaries), used to size the q block."""
    nbuf = 2
    b = nbuf * bq * D * qkv_isz            # q block
    b += nbuf * Lk * D * qkv_isz           # k block (constant along the Lq axis)
    b += nbuf * Lk * Dv * qkv_isz          # v block (constant along the Lq axis)
    b += nbuf * bq * Dv * ctx_isz          # context out block
    if has_mask:
        b += nbuf * bq * Lk * mask_isz     # mask in block
    if emit_attn:
        b += nbuf * bq * Lk * attn_isz     # attention out block
    b += 4 * bq * Lk * 4                   # live f32 temps: scores / keep / e / attn
    return b


def _pick_q_block(Lq, budget_bytes, estimate_fn):
    """Largest power-of-two q block (<= 512) that divides Lq and fits the VMEM budget."""
    divisors = [c for c in (512, 256, 128, 64, 32, 16, 8) if Lq % c == 0]
    if not divisors:
        return Lq                          # odd Lq: single full block (full-dim blocks OK)
    for c in divisors:                     # descending
        if estimate_fn(c) <= budget_bytes:
            return c
    # Nothing fits: take the smallest block; the full-Lk k/v residency dominates.
    # TODO(synk): flash-style Lk tiling would shrink this case further.
    return divisors[-1]


def scaled_dot_product_attention(q, k, v, scale=None, attn_mask=None,
                                 return_attention=True, attn_dtype=None,
                                 use_bf16_matmul=False):
    """Pallas-TPU equivalent of ScaledDotProductAttention.forward.

    q: (B, L_q, D), k: (B, L_k, D), v: (B, L_k, D_v),
    attn_mask: (B, L_q, L_k) or None (nonzero = masked), scale: python float or None.
    attn_dtype: dtype of the returned attention matrix (default: q.dtype). Pass
        jnp.bfloat16 to halve the O(Lq*Lk) HBM writeback when exactness isn't needed.
    use_bf16_matmul: cast f32 q/k/v to bf16 MXU operands (f32 accumulation kept).
    Contract note: D and D_v should ideally be multiples of 128 (fold heads into the
    batch axis) for lane-dense tiles, full MXU contraction width and unmasked stores.
    Note: `if scale:` mirrors the PyTorch truthiness, so scale=0.0 means "no scaling".
    Returns (context (B, L_q, D_v), attention (B, L_q, L_k) or None).
    """
    B, Lq, D = q.shape
    Bk, Lk, Dk = k.shape
    Bv, Lkv, Dv = v.shape
    assert Bk == B and Bv == B and Lkv == Lk and Dk == D

    out_dtype = q.dtype
    attn_out_dtype = jnp.dtype(attn_dtype) if attn_dtype is not None else out_dtype
    has_mask = attn_mask is not None
    eff_scale = float(scale) if scale else 1.0     # mirrors `if scale:` truthiness

    if use_bf16_matmul and q.dtype == jnp.float32:
        # Full-rate MXU and half the q/k/v DMA bytes; accumulation stays f32 in-kernel.
        q = q.astype(jnp.bfloat16)
        k = k.astype(jnp.bfloat16)
        v = v.astype(jnp.bfloat16)

    mask_in = None
    if has_mask:
        if jnp.issubdtype(attn_mask.dtype, jnp.floating):
            mask_in = attn_mask                      # arbitrary float masks: keep exact
        else:
            mask_in = attn_mask.astype(jnp.int8)     # bool/int: 4x smaller DMA + VMEM

    # Generation-aware VMEM sizing (v5e/v6e: 128 MiB per core, v7x: 64 MiB per core).
    vmem_cap = _vmem_capacity_bytes()
    vmem_limit = int(vmem_cap * 0.75)                # headroom for compiler scratch
    qkv_isz = jnp.dtype(q.dtype).itemsize
    mask_isz = jnp.dtype(mask_in.dtype).itemsize if has_mask else 0
    est = functools.partial(
        _estimate_step_vmem, Lk=Lk, D=D, Dv=Dv, qkv_isz=qkv_isz,
        mask_isz=mask_isz, attn_isz=jnp.dtype(attn_out_dtype).itemsize,
        ctx_isz=jnp.dtype(out_dtype).itemsize,
        has_mask=has_mask, emit_attn=return_attention)
    bq = _pick_q_block(Lq, int(vmem_limit * 0.8), est)
    grid = (B, Lq // bq)

    in_specs = [
        pl.BlockSpec((1, bq, D), lambda b, i: (b, i, 0)),    # q: new tile each step
        pl.BlockSpec((1, Lk, D), lambda b, i: (b, 0, 0)),    # k: constant across Lq axis
        pl.BlockSpec((1, Lk, Dv), lambda b, i: (b, 0, 0)),   # v: constant across Lq axis
    ]
    inputs = [q, k, v]
    if has_mask:
        in_specs.append(pl.BlockSpec((1, bq, Lk), lambda b, i: (b, i, 0)))
        inputs.append(mask_in)

    out_specs = [pl.BlockSpec((1, bq, Dv), lambda b, i: (b, i, 0))]
    out_shape = [jax.ShapeDtypeStruct((B, Lq, Dv), out_dtype)]
    if return_attention:
        out_specs.append(pl.BlockSpec((1, bq, Lk), lambda b, i: (b, i, 0)))
        out_shape.append(jax.ShapeDtypeStruct((B, Lq, Lk), attn_out_dtype))

    # Megacore: shard the batch axis only (keeps k/v fetched once per batch per core);
    # with B == 1 fall back to sharding the q-block axis so the second core has work.
    dims = ("parallel", "arbitrary") if B > 1 else ("parallel", "parallel")

    kernel = _make_sdpa_kernel(eff_scale, has_mask, return_attention)

    outs = pl.pallas_call(
        kernel,
        out_shape=tuple(out_shape),
        grid_spec=pltpu.PrefetchScalarGridSpec(
            num_scalar_prefetch=0,
            grid=grid,
            in_specs=in_specs,
            out_specs=out_specs,
        ),
        compiler_params=pltpu.CompilerParams(
            dimension_semantics=dims,
            vmem_limit_bytes=vmem_limit,
        ),
    )(*inputs)

    if return_attention:
        ctx, attn = outs
        return ctx, attn
    ctx = outs[0] if isinstance(outs, (tuple, list)) else outs
    return ctx, None


def _reference(q, k, v, scale=None, attn_mask=None):
    # Pure-JAX reference mirroring the PyTorch forward exactly.
    attention = jnp.einsum("bqd,bkd->bqk", q, k)
    if scale:
        attention = attention * scale
    if attn_mask is not None:
        attention = attention * (1.0 - attn_mask.astype(attention.dtype))
    attention = jax.nn.softmax(attention, axis=2)
    if attn_mask is not None:
        attention = attention * (1.0 - attn_mask.astype(attention.dtype))
        # .clamp(min=1e-8) result is discarded in the original code -> no-op
    context = jnp.einsum("bqk,bkd->bqd", attention, v)
    return context, attention


if __name__ == "__main__":
    key = jax.random.PRNGKey(0)
    kq, kk, kv, km = jax.random.split(key, 4)
    # B=2, seq=8, lane-dense D = Dv = 128 (the kernel's preferred contract).
    B, L, D = 2, 8, 128
    q = jax.random.normal(kq, (B, L, D), dtype=jnp.float32)
    k = jax.random.normal(kk, (B, L, D), dtype=jnp.float32)
    v = jax.random.normal(kv, (B, L, D), dtype=jnp.float32)
    # boolean attention mask (True = masked) -> shipped to the kernel as int8
    attn_mask_bool = jax.random.uniform(km, (B, L, L)) > 0.8
    attn_mask_f32 = attn_mask_bool.astype(jnp.float32)
    scale = 1.0 / (D ** 0.5)

    ctx_ref, attn_ref = _reference(q, k, v, scale=scale, attn_mask=attn_mask_f32)
    ctx_nm_ref, attn_nm_ref = _reference(q, k, v, scale=scale, attn_mask=None)

    # 1) masked path (bool mask -> int8 DMA), full (context, attention) output.
    ctx, attn = scaled_dot_product_attention(q, k, v, scale=scale,
                                             attn_mask=attn_mask_bool)
    jax.block_until_ready((ctx, attn))
    assert jnp.allclose(ctx, ctx_ref, atol=1e-4, rtol=1e-4)
    assert jnp.allclose(attn, attn_ref, atol=1e-4, rtol=1e-4)

    # 2) unmasked path (no synthesized zero mask is DMA'd or multiplied).
    ctx_nm, attn_nm = scaled_dot_product_attention(q, k, v, scale=scale, attn_mask=None)
    jax.block_until_ready((ctx_nm, attn_nm))
    assert jnp.allclose(ctx_nm, ctx_nm_ref, atol=1e-4, rtol=1e-4)
    assert jnp.allclose(attn_nm, attn_nm_ref, atol=1e-4, rtol=1e-4)

    # 3) context-only variant (skips the O(Lq*Lk) attention writeback entirely).
    ctx_only, attn_none = scaled_dot_product_attention(
        q, k, v, scale=scale, attn_mask=attn_mask_bool, return_attention=False)
    jax.block_until_ready(ctx_only)
    assert attn_none is None
    assert jnp.allclose(ctx_only, ctx_ref, atol=1e-4, rtol=1e-4)

    # 4) bf16 attention output (halves the O(Lq*Lk) HBM writeback bytes).
    ctx_b, attn_b = scaled_dot_product_attention(
        q, k, v, scale=scale, attn_mask=attn_mask_bool, attn_dtype=jnp.bfloat16)
    jax.block_until_ready((ctx_b, attn_b))
    assert attn_b.dtype == jnp.bfloat16
    assert jnp.allclose(ctx_b, ctx_ref, atol=1e-4, rtol=1e-4)
    assert jnp.allclose(attn_b.astype(jnp.float32), attn_ref, atol=2e-2, rtol=2e-2)

    # 5) bf16-MXU fast path (f32 inputs cast to bf16 operands, f32 accumulation).
    ctx_f, attn_f = scaled_dot_product_attention(
        q, k, v, scale=scale, attn_mask=attn_mask_bool, use_bf16_matmul=True)
    jax.block_until_ready((ctx_f, attn_f))
    assert ctx_f.dtype == q.dtype
    assert jnp.allclose(ctx_f, ctx_ref, atol=5e-2, rtol=5e-2)
    assert jnp.allclose(attn_f, attn_ref, atol=5e-2, rtol=5e-2)

    print("KERNEL_OK")
</pallas_src>

<mosaic_0001>
module attributes {stable_mosaic.version = 11 : i64} {
  func.func @kernel(%arg0: i32, %arg1: i32, %arg2: memref<1x8x128xf32, #tpu.memory_space<vmem>>, %arg3: memref<1x8x128xf32, #tpu.memory_space<vmem>>, %arg4: memref<1x8x128xf32, #tpu.memory_space<vmem>>, %arg5: memref<1x8x8xi8, #tpu.memory_space<vmem>>, %arg6: memref<1x8x128xf32, #tpu.memory_space<vmem>>, %arg7: memref<1x8x8xf32, #tpu.memory_space<vmem>>) attributes {dimension_semantics = [#tpu.dimension_semantics<parallel>, #tpu.dimension_semantics<arbitrary>], iteration_bounds = array<i64: 2, 1>, scalar_prefetch = 0 : i64, scratch_operands = 0 : i64, tpu.core_type = #tpu.core_type<tc>, window_params = [{transform_indices = @transform_0, window_bounds = array<i64: 1, 8, 128>}, {transform_indices = @transform_1, window_bounds = array<i64: 1, 8, 128>}, {transform_indices = @transform_2, window_bounds = array<i64: 1, 8, 128>}, {transform_indices = @transform_3, window_bounds = array<i64: 1, 8, 8>}, {transform_indices = @transform_4, window_bounds = array<i64: 1, 8, 128>}, {transform_indices = @transform_5, window_bounds = array<i64: 1, 8, 8>}]} {
    %c0 = arith.constant 0 : index
    %c0_0 = arith.constant 0 : index
    %c0_1 = arith.constant 0 : index
    %0 = vector.load %arg2[%c0, %c0_0, %c0_1] : memref<1x8x128xf32, #tpu.memory_space<vmem>>, vector<1x8x128xf32>
    %1 = vector.shape_cast %0 : vector<1x8x128xf32> to vector<8x128xf32>
    %c0_2 = arith.constant 0 : index
    %c0_3 = arith.constant 0 : index
    %c0_4 = arith.constant 0 : index
    %2 = vector.load %arg3[%c0_2, %c0_3, %c0_4] : memref<1x8x128xf32, #tpu.memory_space<vmem>>, vector<1x8x128xf32>
    %3 = vector.shape_cast %2 : vector<1x8x128xf32> to vector<8x128xf32>
    %c0_5 = arith.constant 0 : index
    %c0_6 = arith.constant 0 : index
    %c0_7 = arith.constant 0 : index
    %4 = vector.load %arg4[%c0_5, %c0_6, %c0_7] : memref<1x8x128xf32, #tpu.memory_space<vmem>>, vector<1x8x128xf32>
    %5 = vector.shape_cast %4 : vector<1x8x128xf32> to vector<8x128xf32>
    %cst = arith.constant 0.0883883461 : f32
    %6 = vector.broadcast %cst : f32 to vector<8x128xf32>
    %7 = arith.mulf %1, %6 : vector<8x128xf32>
    %cst_8 = arith.constant dense<0.000000e+00> : vector<8x8xf32>
    %8 = tpu.matmul %7, %3, %cst_8 {dimension_numbers = #tpu.dot_dimension_numbers<[1], [1], [0], [0], [0, 0, 1, 0], [], []>} : vector<8x128xf32>, vector<8x128xf32>, vector<8x8xf32> -> vector<8x8xf32>
    %c0_9 = arith.constant 0 : index
    %c0_10 = arith.constant 0 : index
    %c0_11 = arith.constant 0 : index
    %9 = vector.load %arg5[%c0_9, %c0_10, %c0_11] : memref<1x8x8xi8, #tpu.memory_space<vmem>>, vector<1x8x8xi8>
    %10 = vector.shape_cast %9 : vector<1x8x8xi8> to vector<8x8xi8>
    %11 = arith.sitofp %10 : vector<8x8xi8> to vector<8x8xf32>
    %cst_12 = arith.constant 1.000000e+00 : f32
    %12 = vector.broadcast %cst_12 : f32 to vector<8x8xf32>
    %13 = arith.subf %12, %11 : vector<8x8xf32>
    %14 = arith.mulf %8, %13 : vector<8x8xf32>
    %cst_13 = arith.constant dense<0xFF800000> : vector<8xf32>
    %15 = vector.multi_reduction <maximumf>, %14, %cst_13 [1] : vector<8x8xf32> to vector<8xf32>
    %16 = vector.shape_cast %15 : vector<8xf32> to vector<8x1xf32>
    %17 = vector.broadcast %16 : vector<8x1xf32> to vector<8x8xf32>
    %18 = arith.subf %14, %17 : vector<8x8xf32>
    %19 = math.exp %18 : vector<8x8xf32>
    %cst_14 = arith.constant dense<0.000000e+00> : vector<8xf32>
    %20 = vector.multi_reduction <add>, %19, %cst_14 [1] : vector<8x8xf32> to vector<8xf32>
    %21 = vector.shape_cast %20 : vector<8xf32> to vector<8x1xf32>
    %22 = tpu.reciprocal %21 : vector<8x1xf32> -> vector<8x1xf32>
    %23 = vector.broadcast %22 : vector<8x1xf32> to vector<8x8xf32>
    %24 = arith.mulf %19, %23 : vector<8x8xf32>
    %25 = arith.mulf %24, %13 : vector<8x8xf32>
    %cst_15 = arith.constant dense<0.000000e+00> : vector<8x128xf32>
    %26 = tpu.matmul %25, %5, %cst_15 {dimension_numbers = #tpu.dot_dimension_numbers<[1], [0], [0], [1], [0, 0, 1, 1], [], []>} : vector<8x8xf32>, vector<8x128xf32>, vector<8x128xf32> -> vector<8x128xf32>
    %c0_16 = arith.constant 0 : index
    %c0_17 = arith.constant 0 : index
    %c0_18 = arith.constant 0 : index
    %27 = vector.load %arg6[%c0_16, %c0_17, %c0_18] : memref<1x8x128xf32, #tpu.memory_space<vmem>>, vector<1x8x128xf32>
    %28 = vector.shape_cast %27 : vector<1x8x128xf32> to vector<8x128xf32>
    %29 = vector.shape_cast %26 : vector<8x128xf32> to vector<1x8x128xf32>
    tpu.vector_store %arg6[%c0_16, %c0_17, %c0_18], %29 {strides = array<i32>} : memref<1x8x128xf32, #tpu.memory_space<vmem>>, vector<1x8x128xf32>,
    %c0_19 = arith.constant 0 : index
    %c0_20 = arith.constant 0 : index
    %c0_21 = arith.constant 0 : index
    %30 = vector.load %arg7[%c0_19, %c0_20, %c0_21] : memref<1x8x8xf32, #tpu.memory_space<vmem>>, vector<1x8x8xf32>
    %31 = vector.shape_cast %30 : vector<1x8x8xf32> to vector<8x8xf32>
    %32 = vector.shape_cast %25 : vector<8x8xf32> to vector<1x8x8xf32>
    tpu.vector_store %arg7[%c0_19, %c0_20, %c0_21], %32 {strides = array<i32>} : memref<1x8x8xf32, #tpu.memory_space<vmem>>, vector<1x8x8xf32>,
    return
  }
  func.func @transform_0(%arg0: i32, %arg1: i32) -> (i32, i32, i32) {
    %c0_i32 = arith.constant 0 : i32
    %c0_i32_0 = arith.constant 0 : i32
    return %arg0, %arg1, %c0_i32 : i32, i32, i32
  }
  func.func @transform_1(%arg0: i32, %arg1: i32) -> (i32, i32, i32) {
    %c0_i32 = arith.constant 0 : i32
    %c0_i32_0 = arith.constant 0 : i32
    %c0_i32_1 = arith.constant 0 : i32
    return %arg0, %c0_i32, %c0_i32_0 : i32, i32, i32
  }
  func.func @transform_2(%arg0: i32, %arg1: i32) -> (i32, i32, i32) {
    %c0_i32 = arith.constant 0 : i32
    %c0_i32_0 = arith.constant 0 : i32
    %c0_i32_1 = arith.constant 0 : i32
    return %arg0, %c0_i32, %c0_i32_0 : i32, i32, i32
  }
  func.func @transform_3(%arg0: i32, %arg1: i32) -> (i32, i32, i32) {
    %c0_i32 = arith.constant 0 : i32
    %c0_i32_0 = arith.constant 0 : i32
    return %arg0, %arg1, %c0_i32 : i32, i32, i32
  }
  func.func @transform_4(%arg0: i32, %arg1: i32) -> (i32, i32, i32) {
    %c0_i32 = arith.constant 0 : i32
    %c0_i32_0 = arith.constant 0 : i32
    return %arg0, %arg1, %c0_i32 : i32, i32, i32
  }
  func.func @transform_5(%arg0: i32, %arg1: i32) -> (i32, i32, i32) {
    %c0_i32 = arith.constant 0 : i32
    %c0_i32_0 = arith.constant 0 : i32
    return %arg0, %arg1, %c0_i32 : i32, i32, i32
  }
}

</mosaic_0001>

<bundles_post_ra>
// kernel: tpu_custom_call.1
= control target key start
LH: loop header
LB: loop body
LE: loop exit
PB: predicated region body
PF: predicated region fallthrough
CT: control target
= control target key end

     0   :  { %s1410_s0 = inlined_call_operand.hbm [shape: f32[2,8,128], index: 0, kind: input, shape index: {}]   ;;  %s1411_s1 = inlined_call_operand.hbm [shape: f32[2,8,128], index: 1, kind: input, shape index: {}]   ;;  %s1412_s2 = inlined_call_operand.hbm [shape: f32[2,8,128], index: 2, kind: input, shape index: {}]   ;;  %s1413_s3 = inlined_call_operand.vmem [shape: s8[2,8,8], index: 3, kind: input, shape index: {}]   ;;  %s1414_s4 = inlined_call_operand.hbm [shape: f32[2,8,128], index: 4, kind: output, shape index: {0}]   ;;  %s1415_s5 = inlined_call_operand.hbm [shape: f32[2,8,8], index: 5, kind: output, shape index: {1}]  }
   0x1   :  { %1425 = sst [smem:[#allocation20_spill]] %s1411_s1 }
   0x2   :  { %11 = vsyncpa [#allocation3], 0 }
   0x3   :  { %13 = vsyncpa [#allocation3 + $0x1], 0 }
   0x4   :  { %14 = vsyncpa [#allocation6], 0 }
   0x5   :  { %16 = vsyncpa [#allocation6 + $0x1], 0 }
   0x6   :  { %17 = vsyncpa [#allocation4], 0 }
   0x7   :  { %19 = vsyncpa [#allocation4 + $0x1], 0 }
   0x8   :  { %20 = vsyncpa [#allocation10], 0 }
   0x9   :  { %22 = vsyncpa [#allocation10 + $0x1], 0  ;;  %s1109_s18 = smov 0   ;;  %s1111_s19 = smov 0  }
   0xa   :  { %s1113_s20 = smov 0   ;;  %s1115_s21 = smov 0  }
   0xb   :  { %s1117_s22 = smov 0   ;;  %s1119_s23 = smov 0  }
   0xc LB: > { %1426 = sst [smem:[#allocation15_spill]] %s1066_s22  ;;  %s1140_s24 = sadd.s32 4294967295, %s1070_s23   ;;  %s1070_s23 = sphi %s1119_s23, %s28_s23   ;;  %s1066_s22 = sphi %s1117_s22, %s1452_s22   ;;  %s1062_s21 = sphi %s1115_s21, %s1451_s21   ;;  %s1058_s20 = sphi %s1113_s20, %s1455_s20   ;;  %s1054_s19 = sphi %s1111_s19, %s1454_s19   ;;  %s1050_s18 = sphi %s1109_s18, %s1453_s18  }
   0xd   : > { %1427 = sst [smem:[#allocation16_spill]] %s1070_s23  ;;  %s742_s25 = sadd.s32 4294967294, %s1070_s23  }
   0xe   : > { %s40_s26 = sadd.s32 1, %s1066_s22  ;;  %s49_s27 = sadd.s32 1, %s1058_s20 }
   0xf   : > { %p42_p0 = scmp.ge.s32.totalorder %s40_s26, 2  ;;  %p56_p1 = scmp.ne.s32.totalorder %s1058_s20, %s1054_s19 }
  0x10   : > { %p57_p2 = scmp.eq.s32.totalorder %s1070_s23, 0  ;;  %p62_p3 = scmp.ne.s32.totalorder %s1054_s19, %s1050_s18 }
  0x11   : > { %s1457_s26 = smov (%p42_p0, %s40_s26), 0  ;;  %p63_p5 = scmp.eq.s32.totalorder %s1140_s24, 0 }
  0x12   : > { %1428 = sst [smem:[#allocation17_spill]] %s1457_s26  ;;  %p1152_p4 = por %p57_p2, %p56_p1 }
  0x13   : > { %s44_s29 = ssub.s32 %s1066_s22, %s1457_s26  ;;  %p168_p6 = scmp.eq.s32.totalorder %s1140_s24, 1 }
  0x14   : > { %p47_p7 = scmp.eq.s32.totalorder %s44_s29, 0  ;;  %p1160_p8 = por %p63_p5, %p62_p3 }
  0x15   : > { %p1164_p9 = por %p168_p6, %p56_p1  ;;  %p174_p10 = scmp.eq.s32.totalorder %s742_s25, 1 }
  0x16   : > { %s1430_s30 = scalar_select %p1160_p8, 1, 0 }
  0x17   : > { %s1431_s6 = scalar_select %p1164_p9, 1, 0 }
  0x18   : > { %s1169_s7 = scalar_select %p47_p7, %s1058_s20, %s49_s27  }
  0x19   : > { %p1171_p11 = por %p174_p10, %p62_p3  ;;  %p806_p13 = scmp.lt.s32.totalorder %s1070_s23, 2 }
  0x1a   : > { %1432 = sst [smem:[#allocation18_spill]] %s1169_s7  ;;  %s1416_s9 = sand.u32 1, %s1058_s20  }
  0x1b   : > { %s1433_s8 = scalar_select %p1171_p11, 1, 0 }
  0x1c   : > { %s1180_s10 = sshll.u32 %s1416_s9, 3  ;;  %s1183_s11 = sshll.u32 %s1066_s22, 7 }
  0x1d   : > { %1434 = sst [smem:[#allocation19_spill]] %s1433_s8  ;;  %p1187_p0 = pnand %p806_p13, %p1152_p4 }
  0x1e   : > { %s241_s13 = sand.u32 1, %s1070_s23   ;;  %s1436_s1 = sld [smem:[#allocation20_spill]] }
  0x1f   : > { %s1435_s12 = scalar_select %p1187_p0, 1, 0 }
  0x20   : > { %s245_s17 = scalar_lea.vmem [#allocation5], %s1180_s10  ;;  %s1203_s27 = scalar_lea.sflag [#allocation6], %s241_s13 }
  0x21   : > { %s252_s25 = sshll.u32 %s245_s17, 4  ;;  %p1209_p4 = pneg %p1187_p0  ;;  %s1200_s25 = int_to_ptr.vmem [resolvable:$true] %s252_s25 }
  0x24   : > { %s1196_s16 = scalar_lea.hbm %s1436_s1, %s1183_s11  ;;  %s867_s17 = scalar_lea.hbm %s1436_s1, 256 }
  0x25   : > { %s862_s28 = scalar_lea.hbm %s1196_s16, 128  ;;  %p868_p7 = scmp.lt.u32.totalorder %s1196_s16, %s1436_s1 }
  0x26   : > { %p863_p3 = scmp.ne.s32.totalorder %s1196_s16, %s862_s28  ;;  %p869_p10 = scmp.lt.u32.totalorder %s867_s17, %s862_s28 }
  0x27   : > { %p871_p12 = scmp.lt.u32.totalorder %s862_s28, %s1196_s16 }
  0x28   : > { %p865_p5 = pnand %p1209_p4, %p863_p3  ;;  %p870_p13 = por %p869_p10, %p868_p7 }
  0x2a   : > { %p866_p6 = pneg %p865_p5  ;;  %p872_p1 = por %p871_p12, %p870_p13 }
  0x2c   : > { %p873_p2 = pnand %p872_p1, %p866_p6 }
  0x2e   : > { %876 = shalt.err (!%p873_p2)
}
  0x2f   : > { %s877_s13 = scalar_lea.vmem %s1200_s25, 128  ;;  %s1072_s14 = smov [#allocation5]  }
  0x30   : > { %p878_p3 = scmp.ne.s32.totalorder %s1200_s25, %s877_s13  ;;  %s882_s15 = sshll.u32 %s1072_s14, 4  ;;  %s883_s15 = int_to_ptr.vmem [resolvable:$false] %s882_s15 }
  0x31   : > { %s884_s26 = scalar_lea.vmem %s883_s15, 256  ;;  %p885_p9 = scmp.lt.s32.totalorder %s1200_s25, %s883_s15 }
  0x32   : > { %p880_p5 = pnand %p878_p3, %p1209_p4  ;;  %p886_p8 = scmp.lt.s32.totalorder %s884_s26, %s877_s13 }
  0x34   : > { %p881_p11 = pneg %p880_p5  ;;  %p887_p7 = por %p886_p8, %p885_p9 }
  0x36   : > { %p888_p10 = pnand %p887_p7, %p881_p11 }
  0x38   : > { %891 = shalt.err (!%p888_p10)
}
  0x39   : > { %795 = dma.hbm_to_vmem [thread:$0]  (!%p1187_p0), %s1196_s16, 128, %s1200_s25, %s1203_s27  }
  0x3a   : > { %p1438_p12 = scmp.lt.s32.totalorder %s1070_s23, 3  ;;  %p1439_p1 = scmp.ge.s32.totalorder %s1070_s23, 1 }
  0x3b   : > { %s1245_s13 = scalar_lea.hbm %s1410_s0, %s1183_s11  ;;  %s226_s14 = scalar_lea.vmem [#allocation2], %s1180_s10 }
  0x3c   : > { %p1237_p2 = pnand %p1439_p1, %p1438_p12  ;;  %s234_s15 = sshll.u32 %s226_s14, 4  ;;  %s1248_s15 = int_to_ptr.vmem [resolvable:$true] %s234_s15 }
  0x3d   : > { %s1254_s26 = scalar_lea.hbm %s1412_s2, %s1183_s11  ;;  %s1441_s1 = sand.u32 1, %s1058_s20  }
  0x3e   : > { %s1440_s9 = scalar_select %p1237_p2, 1, 0 }
  0x3f   : > { %s223_s22 = scalar_lea.sflag [#allocation3], %s1441_s1  ;;  %s892_s7 = scalar_lea.hbm %s1245_s13, 128 }
  0x40   : > { %p893_p8 = scmp.ne.s32.totalorder %s1245_s13, %s892_s7  ;;  %s897_s23 = scalar_lea.hbm %s1410_s0, 256 }
  0x41   : > { %p898_p6 = scmp.lt.u32.totalorder %s1245_s13, %s1410_s0  ;;  %p899_p13 = scmp.lt.u32.totalorder %s897_s23, %s892_s7 }
  0x42   : > { %p895_p9 = pnand %p893_p8, %p1209_p4  ;;  %p901_p5 = scmp.lt.u32.totalorder %s892_s7, %s1245_s13 }
  0x43   : > { %p900_p3 = por %p899_p13, %p898_p6 }
  0x44   : > { %p896_p11 = pneg %p895_p9 }
  0x45   : > { %p902_p7 = por %p901_p5, %p900_p3 }
  0x47   : > { %p903_p10 = pnand %p902_p7, %p896_p11 }
  0x49   : > { %906 = shalt.err (!%p903_p10)
}
  0x4a   : > { %s907_s1 = scalar_lea.vmem %s1248_s15, 128  ;;  %s1073_s11 = smov [#allocation2]  }
  0x4b   : > { %p908_p12 = scmp.ne.s32.totalorder %s1248_s15, %s907_s1  ;;  %s912_s16 = sshll.u32 %s1073_s11, 4  ;;  %s913_s16 = int_to_ptr.vmem [resolvable:$false] %s912_s16 }
  0x4c   : > { %s914_s8 = scalar_lea.vmem %s913_s16, 256  ;;  %p915_p9 = scmp.lt.s32.totalorder %s1248_s15, %s913_s16 }
  0x4d   : > { %p910_p1 = pnand %p908_p12, %p1209_p4  ;;  %p916_p2 = scmp.lt.s32.totalorder %s914_s8, %s907_s1 }
  0x4f   : > { %p911_p8 = pneg %p910_p1  ;;  %p917_p6 = por %p916_p2, %p915_p9 }
  0x51   : > { %p918_p13 = pnand %p917_p6, %p911_p8 }
  0x53   : > { %921 = shalt.err (!%p918_p13)
}
  0x54   : > { %792 = dma.hbm_to_vmem [thread:$0]  (!%p1187_p0), %s1245_s13, 128, %s1248_s15, %s223_s22  }
  0x55   : > { %s263_s23 = scalar_lea.vmem [#allocation7], %s1180_s10  ;;  %s922_s25 = scalar_lea.hbm %s1254_s26, 128 }
  0x56   : > { %s270_s7 = sshll.u32 %s263_s23, 4  ;;  %p923_p11 = scmp.ne.s32.totalorder %s1254_s26, %s922_s25  ;;  %s271_s7 = int_to_ptr.vmem [resolvable:$true] %s270_s7 }
  0x57   : > { %s927_s14 = scalar_lea.hbm %s1412_s2, 256  ;;  %p928_p5 = scmp.lt.u32.totalorder %s1254_s26, %s1412_s2 }
  0x58   : > { %p925_p2 = pnand %p923_p11, %p1209_p4  ;;  %p929_p7 = scmp.lt.u32.totalorder %s927_s14, %s922_s25 }
  0x59   : > { %p931_p12 = scmp.lt.u32.totalorder %s922_s25, %s1254_s26 }
  0x5a   : > { %p926_p3 = pneg %p925_p2  ;;  %p930_p10 = por %p929_p7, %p928_p5 }
  0x5c   : > { %p932_p1 = por %p931_p12, %p930_p10 }
  0x5e   : > { %p933_p8 = pnand %p932_p1, %p926_p3 }
  0x60   : > { %936 = shalt.err (!%p933_p8)
}
  0x61   : > { %s937_s22 = scalar_lea.vmem %s271_s7, 128  ;;  %s1074_s10 = smov [#allocation7]  }
  0x62   : > { %p938_p9 = scmp.ne.s32.totalorder %s271_s7, %s937_s22  ;;  %s942_s13 = sshll.u32 %s1074_s10, 4  ;;  %s943_s13 = int_to_ptr.vmem [resolvable:$false] %s942_s13 }
  0x63   : > { %s944_s15 = scalar_lea.vmem %s943_s13, 256  ;;  %p945_p11 = scmp.lt.s32.totalorder %s271_s7, %s943_s13 }
  0x64   : > { %p940_p6 = pnand %p938_p9, %p1209_p4  ;;  %p946_p2 = scmp.lt.s32.totalorder %s944_s15, %s937_s22 }
  0x66   : > { %p941_p13 = pneg %p940_p6  ;;  %p947_p0 = por %p946_p2, %p945_p11 }
  0x68   : > { %p948_p5 = pnand %p947_p0, %p941_p13 }
  0x6a   : > { %951 = shalt.err (!%p948_p5)
}
  0x6b   : > { %p1442_p7 = scmp.ne.s32.totalorder %s1435_s12, 0  ;;  %p1443_p3 = scmp.ne.s32.totalorder %s1440_s9, 0 }
  0x6c   : > { %s1301_s29 = sand.u32 (!%p1443_p3), 1, %s1054_s19   ;;  %p1444_p0 = scmp.ne.s32.totalorder (!%p1443_p3), %s1430_s30, 0 }
  0x6d   : > { %798 = dma.hbm_to_vmem [thread:$0]  (!%p1442_p7), %s1254_s26, 128, %s271_s7, %s1203_s27  }
  0x6e   : > { %289 = sbr.rel (%p1443_p3) target bundleno = 883 (0x373), region = 36  ;;  %s1304_s16 = sshll.u32 (!%p1443_p3), %s1301_s29, 3 }
  0x6f   : > { %s292_s8 = scalar_lea.sflag (!%p1443_p3), [#allocation3], %s1301_s29  ;;  %s295_s23 = scalar_lea.vmem (!%p1443_p3), [#allocation2], %s1304_s16 }
  0x75   : > { %1033 = dma.done.wait (%p1444_p0), %s292_s8, 128  }
  0x76   : > { %1035 = vsyncadd (%p1444_p0), %s292_s8, 4294967168  ;;  %s300_s12 = sand.u32 1, %s1140_s24   ;;  %s304_s9 = scalar_lea.vmem [#allocation5], %s1304_s16 }
  0x77   : > { %s301_s27 = scalar_lea.sflag [#allocation6], %s300_s12 }
  0x78   : > { %1037 = dma.done.wait (%p1444_p0), %s301_s27, 256  }
  0x79   : > { %1039 = vsyncadd (%p1444_p0), %s301_s27, 4294967040  ;;  %v1075_v0 = vmov 0.0   ;;  %vm1076_vm0 = vmmov 0   ;;  %v370_v1 = vld [vmem:[%s304_s9] sm:$0xff]  ;;  %v369_v2 = vld [vmem:[%s295_s23] sm:$0xff]  ;;  %p362_p4 = scmp.lt.s32.totalorder %s1062_s21, 1 }
  0x7a   : > { %769 = vmatprep.subr.mxu0 %v1075_v0  ;;  %771 = vmatprep.mubr.msk.f32.mxu0 %vm1076_vm0, %v1075_v0  ;;  %v372_v3 = vmul.f32 0.088388346, %v369_v2  ;;  %vm448_vm1 = vcmask 64512   ;;  %s313_s28 = scalar_lea.vmem [#allocation7], %s1304_s16  ;;  %s361_s17 = scalar_lea.vmem [#allocation9], %s1304_s16 }
  0x7b   : > { %774 = vmatprep.subr.mxu1 %v1075_v0  ;;  %776 = vmatprep.mubr.msk.f32.mxu1 %vm1076_vm0, %v1075_v0  ;;  %s363_s24 = scalar_select %p362_p4, %s1062_s21, 1  ;;  %v371_v17 = vld [vmem:[%s313_s28] sm:$0xff] }
  0x7c   : > { %770 = vmatpush3.xpose.msra.mxu0 %v370_v1  ;;  %775 = vmatpush3.msra.mxu1 %v371_v17  ;;  %s761_s14 = sshll.u32 %s1062_s21, 7  ;;  %s570_s10 = sshll.u32 %s361_s17, 4  ;;  %s571_s10 = int_to_ptr.vmem [resolvable:$true] %s570_s10 }
  0x7d   : > { %s757_s26 = sshll.u32 %s363_s24, 1  ;;  %s1335_s22 = scalar_lea.hbm %s1415_s5, %s761_s14 }
  0x7e   : > { %s368_s30 = scalar_lea.vmem %s1413_s3, %s757_s26  ;;  %s542_s13 = scalar_lea.sflag [#allocation10], %s1301_s29 }
  0x7f   : > { %772 = vmatmul.mubr.f32.vlgmr.msra.gmra.mrb[0].mxu0 %v372_v3  ;;  %v443_v4 = vld [vmem:[%s368_s30] sm:$0x3]  ;;  %s952_s15 = scalar_lea.vmem %s571_s10, 128  ;;  %p1445_p12 = scmp.ne.s32.totalorder %s1431_s6, 0 }
  0x80   : > { %v444_v5 = vunpack.c.0.s8 %v443_v4  ;;  %p953_p10 = scmp.ne.s32.totalorder %s571_s10, %s952_s15  ;;  %s1077_s8 = smov [#allocation9]  }
  0x81   : > { %s956_s23 = sshll.u32 %s1077_s8, 4  ;;  %s957_s23 = int_to_ptr.vmem [resolvable:$false] %s956_s23 }
  0x82   : > { %v445_v6 = vcvt.s32.f32 %v444_v5  ;;  %p954_p1 = pnand %p953_p10, %p1445_p12  ;;  %s958_s12 = scalar_lea.vmem %s957_s23, 256 }
  0x83   : > { %p959_p9 = scmp.lt.s32.totalorder %s571_s10, %s957_s23  ;;  %p960_p6 = scmp.lt.s32.totalorder %s958_s12, %s952_s15 }
  0x84   : > { %v446_v7 = vsub.f32 1.0, %v445_v6  ;;  %p955_p8 = pneg %p954_p1 }
  0x85   : > { %p961_p13 = por %p960_p6, %p959_p9 }
  0x87   : > { %p962_p11 = pnand %p961_p13, %p955_p8 }
 0x152   : > { %v439_v8 = vpop.f32.mrb[0].mxu0 }
 0x153   : > { %v447_v9 = vmul.f32 %v446_v7, %v439_v8  ;;  %v773_v10 = vpop.f32.mrb[1].mxu0 }
 0x155   : > { %v449_v11 = vsel %vm448_vm1, %v447_v9, -inf }
 0x156   : > { %450 = vmax.xlane.f32.xlu0 %v449_v11 }
 0x1e3   : > { %v451_v12 = vpop.xlane.xlu0 %450 }
 0x1e4   : > { %v452_v13 = vsub.f32 %v447_v9, %v451_v12 }
 0x1e6   : > { %v453_v14 = vmul.f32 1.442695, %v452_v13 }
 0x1e8   : > { %858 = vpow2.f32 %v453_v14 }
 0x1f2   : > { %v859_v15 = vpop.eup %858 }
 0x1f3   : > { %v455_v16 = vsel %vm448_vm1, %v859_v15, 0.0 }
 0x1f4   : > { %456 = vadd.xlane.f32.xlu0 %v455_v16 }
 0x281   : > { %v457_v18 = vpop.xlane.xlu0 %456 }
 0x282   : > { %860 = vrcp.f32 %v457_v18 }
 0x28c   : > { %v861_v19 = vpop.eup %860 }
 0x28d   : > { %v459_v20 = vmul.f32 %v861_v19, %v859_v15 }
 0x28f   : > { %v460_v21 = vmul.f32 %v459_v20, %v446_v7 }
 0x291   : > { %777 = vmatmul.mubr.msk.f32.vlgmr.msra.gmra.mrb[0].mxu1 %vm448_vm1, %v460_v21  ;;  %535 = vst.msk [vmem:[%s361_s17] sm:$0xff] %vm448_vm1, %v460_v21 }
 0x292   : > { %965 = shalt.err (!%p962_p11)
}
 0x293   : > { %s966_s27 = scalar_lea.hbm %s1335_s22, 128  ;;  %s970_s26 = scalar_lea.hbm %s1415_s5, 256 }
 0x294   : > { %p967_p2 = scmp.ne.s32.totalorder %s1335_s22, %s966_s27  ;;  %p971_p3 = scmp.lt.u32.totalorder %s1335_s22, %s1415_s5 }
 0x295   : > { %p972_p0 = scmp.lt.u32.totalorder %s970_s26, %s966_s27  ;;  %p974_p10 = scmp.lt.u32.totalorder %s966_s27, %s1335_s22 }
 0x296   : > { %p968_p5 = pnand %p967_p2, %p1445_p12 }
 0x297   : > { %p973_p4 = por %p972_p0, %p971_p3 }
 0x298   : > { %p969_p7 = pneg %p968_p5 }
 0x299   : > { %p975_p1 = por %p974_p10, %p973_p4 }
 0x29b   : > { %p976_p8 = pnand %p975_p1, %p969_p7 }
 0x29d   : > { %979 = shalt.err (!%p976_p8)
}
 0x29e   : > { %786 = dma.vmem_to_hbm [thread:$0]  (%p1445_p12), %s571_s10, 128, %s1335_s22, %s542_s13  }
 0x29f   : > { %s354_s30 = scalar_lea.vmem [#allocation8], %s1304_s16  ;;  %s1363_s11 = scalar_lea.hbm %s1414_s4, %s761_s14 }
 0x2a0   : > { %s556_s28 = sshll.u32 %s354_s30, 4  ;;  %s537_s15 = scalar_lea.sflag [#allocation4], %s1301_s29  ;;  %s1356_s28 = int_to_ptr.vmem [resolvable:$true] %s556_s28 }
 0x2a1   : > { %s980_s8 = scalar_lea.vmem %s1356_s28, 128  ;;  %s1078_s16 = smov [#allocation8]  }
 0x2a2   : > { %p981_p9 = scmp.ne.s32.totalorder %s1356_s28, %s980_s8  ;;  %s984_s22 = sshll.u32 %s1078_s16, 4  ;;  %s985_s22 = int_to_ptr.vmem [resolvable:$false] %s984_s22 }
 0x2a3   : > { %s986_s21 = scalar_lea.vmem %s985_s22, 256  ;;  %p987_p11 = scmp.lt.s32.totalorder %s1356_s28, %s985_s22 }
 0x2a4   : > { %p982_p6 = pnand %p981_p9, %p1445_p12  ;;  %p988_p2 = scmp.lt.s32.totalorder %s986_s21, %s980_s8 }
 0x2a6   : > { %p983_p13 = pneg %p982_p6  ;;  %p989_p5 = por %p988_p2, %p987_p11 }
 0x2a8   : > { %p990_p7 = pnand %p989_p5, %p983_p13 }
 0x364   : > { %v530_v22 = vpop.f32.mrb[0].mxu1 }
 0x365   : > { %534 = vst [vmem:[%s354_s30] sm:$0xff] %v530_v22  ;;  %v778_v23 = vpop.f32.mrb[1].mxu1 }
 0x366   : > { %993 = shalt.err (!%p990_p7)
}
 0x367   : > { %s994_s29 = scalar_lea.hbm %s1363_s11, 128  ;;  %s998_s13 = scalar_lea.hbm %s1414_s4, 256 }
 0x368   : > { %p995_p3 = scmp.ne.s32.totalorder %s1363_s11, %s994_s29  ;;  %p999_p10 = scmp.lt.u32.totalorder %s1363_s11, %s1414_s4 }
 0x369   : > { %p1000_p1 = scmp.lt.u32.totalorder %s998_s13, %s994_s29  ;;  %p1002_p9 = scmp.lt.u32.totalorder %s994_s29, %s1363_s11 }
 0x36a   : > { %p996_p0 = pnand %p995_p3, %p1445_p12 }
 0x36b   : > { %p1001_p8 = por %p1000_p1, %p999_p10 }
 0x36c   : > { %p997_p4 = pneg %p996_p0 }
 0x36d   : > { %p1003_p6 = por %p1002_p9, %p1001_p8 }
 0x36f   : > { %p1004_p13 = pnand %p1003_p6, %p997_p4 }
 0x371   : > { %1007 = shalt.err (!%p1004_p13)
}
 0x372   : > { %785 = dma.vmem_to_hbm [thread:$0]  (%p1445_p12), %s1356_s28, 128, %s1363_s11, %s537_s15  }
 0x373 PF: > { %s1446_s27 = sld [smem:[#allocation19_spill]]  ;;  %s1447_s9 = sld [smem:[#allocation16_spill]] }
 0x374   : > { %s582_s24 = sand.u32 1, %s1050_s18  }
 0x375   : > { %s583_s26 = scalar_lea.sflag [#allocation4], %s582_s24 }
 0x379   : > { %p1448_p11 = scmp.ne.s32.totalorder %s1446_s27, 0  ;;  %p1449_p2 = scmp.ge.s32.totalorder %s1447_s9, 2 }
 0x37b   : > { %p800_p5 = pnand %p1449_p2, %p1448_p11 }
 0x37d   : > { %1041 = dma.done.wait (!%p800_p5), %s583_s26, 128  }
 0x37e   : > { %1043 = vsyncadd (!%p800_p5), %s583_s26, 4294967168  ;;  %s592_s7 = scalar_lea.sflag [#allocation10], %s582_s24 }
 0x37f   : > { %1045 = dma.done.wait (!%p800_p5), %s592_s7, 128  }
 0x380   : > { %1047 = vsyncadd (!%p800_p5), %s592_s7, 4294967168  ;;  %s28_s23 = sadd.s32 1, %s1447_s9   ;;  %s1450_s6 = sld [smem:[#allocation18_spill]] }
 0x381   : > { %p25_p7 = scmp.ge.s32.totalorder %s28_s23, 4   ;;  %s1451_s21 = sld [smem:[#allocation15_spill]] }
 0x382   : > { %s1452_s22 = sld [smem:[#allocation17_spill]]  ;;  %s1453_s18 = smov %s1054_s19 }
 0x383   : > { %s1454_s19 = smov %s1058_s20  ;;  %27 = sbr.rel (!%p25_p7) target bundleno = 12 (0xc), region = 125 }
 0x386   : > { %s1455_s20 = smov %s1450_s6 }
 0x38a   :  { %597 = vsyncpa [#allocation3], 1 }
 0x38b   :  { %599 = vsyncpa [#allocation3 + $0x1], 1 }
 0x38c   :  { %600 = vsyncpa [#allocation6], 1 }
 0x38d   :  { %602 = vsyncpa [#allocation6 + $0x1], 1 }
 0x38e   :  { %603 = vsyncpa [#allocation4], 1 }
 0x38f   :  { %605 = vsyncpa [#allocation4 + $0x1], 1 }
 0x390   :  { %606 = vsyncpa [#allocation10], 1 }
 0x391   :  { %608 = vsyncpa [#allocation10 + $0x1], 1 }

</bundles_post_ra>
